<compile_context>
chip_gen: v7x
topology: tpu7x:2x2x1
jax: 0.10.0
libtpu: 0.0.40
codegen_flags: <defaults>
</compile_context>

<pallas_src>
import functools

import jax
import jax.numpy as jnp
from jax import lax
from jax.experimental import pallas as pl
from jax.experimental.pallas import tpu as pltpu


def _round_up(x, m):
    return ((x + m - 1) // m) * m


def _choose_batch_tile(batch, fits, max_tile=16):
    """Largest batch tile (<= max_tile) whose VMEM footprint fits the budget.

    Prefers exact divisors of `batch` (no padding / no ragged block).  Returns
    (tile, pad_batch): if `pad_batch` is True the caller should pad the batch
    up to a multiple of `tile` instead of degrading to a tiny divisor.
    """
    cap = 1
    for t in range(1, min(max_tile, batch) + 1):
        if fits(t):
            cap = t
    best_div = max(d for d in range(1, cap + 1) if batch % d == 0)
    if 2 * best_div >= cap:
        return best_div, False
    return cap, True


def _selayer_kernel(x_ref, w_ref, b_ref, pool_ref, w1_ref, b1_ref, w2_ref,
                    b2_ref, o_ref, *, kernel_size, stride, pad, l_out,
                    conv_lanes):
    # x_ref   : (Bt, C_in, L)        input batch tile
    # w_ref   : (C_out, K*C_in)      fused conv weight (k-major contraction)
    # b_ref   : (C_out, 1)           conv bias
    # pool_ref: (Bt*CL, Bt)          pooling matrix (1/L_out on valid lanes)
    # w1_ref  : (C_r, C_out)  b1_ref: (C_r, 1)     SE fc1
    # w2_ref  : (C_out, C_r)  b2_ref: (C_out, 1)   SE fc2
    # o_ref   : (Bt, C_out, Lp)      lane-dense output tile
    bt, c_in, l_in = x_ref.shape
    c_out, lp = o_ref.shape[1], o_ref.shape[2]
    cl = conv_lanes
    pad_r = cl + kernel_size - 1 - pad - l_in     # right zero columns, >= pad

    # --- im2col slab for the WHOLE batch tile: (K*C_in, Bt*cl).
    # Zero padding is done on values (no VMEM scratch, no vector-store
    # pressure, no cross-grid-step init hazard).
    cols = []
    for bi in range(bt):
        xb = x_ref[bi].astype(jnp.float32)                        # (C_in, L)
        pieces = [xb]
        if pad > 0:
            pieces.insert(0, jnp.zeros((c_in, pad), jnp.float32))
        if pad_r > 0:
            pieces.append(jnp.zeros((c_in, pad_r), jnp.float32))
        xp = jnp.concatenate(pieces, axis=1) if len(pieces) > 1 else xb
        # K shifted views stacked along the contraction dim for this element.
        cols.append(jnp.concatenate(
            [xp[:, k:k + cl] for k in range(kernel_size)], axis=0))  # (K*C_in, cl)
    slab = jnp.concatenate(cols, axis=1)                             # (K*C_in, Bt*cl)

    # --- one MXU matmul for the conv across the whole tile; fused bias + ReLU
    # --- as a single VPU pass (single broadcast, hoisted out of any loop).
    acc = jnp.dot(w_ref[...], slab, preferred_element_type=jnp.float32)
    y = jnp.maximum(acc + b_ref[...], 0.0)                           # (C_out, Bt*cl)

    # --- SE squeeze: per-element (strided) mean via one MXU matmul with the
    # --- pooling matrix; its zeros exclude padded / off-stride lanes, so no
    # --- full-tile mask multiply is needed and the mean stays exact.
    s = jnp.dot(y, pool_ref[...], preferred_element_type=jnp.float32)  # (C_out, Bt)
    z = jnp.maximum(
        jnp.dot(w1_ref[...], s, preferred_element_type=jnp.float32) + b1_ref[...],
        0.0)                                                           # (C_r, Bt)
    g = jax.nn.sigmoid(
        jnp.dot(w2_ref[...], z, preferred_element_type=jnp.float32) + b2_ref[...])

    # --- gated output: exactly one store per element (no pre-gate stash +
    # --- rewrite of the output tile).
    for bi in range(bt):
        yb = y[:, bi * cl:(bi + 1) * cl]
        if stride > 1:
            # TODO(synk): strided lane slicing is a lightly-exercised Mosaic
            # path; verify lowering/perf before relying on stride > 1.
            yb = yb[:, :(l_out - 1) * stride + 1:stride]
            if lp > l_out:
                yb = jnp.concatenate(
                    [yb, jnp.zeros((c_out, lp - l_out), jnp.float32)], axis=1)
        elif lp < cl:
            yb = yb[:, :lp]
        o_ref[bi] = (yb * g[:, bi:bi + 1]).astype(o_ref.dtype)


def selayer_forward(x, conv_w, conv_b, fc1_w, fc1_b, fc2_w, fc2_b, *, stride=1):
    B, C_in, L = x.shape
    C_out, _, K = conv_w.shape
    C_r = fc1_w.shape[0]
    pad = K // 2
    L_out = (L + 2 * pad - K) // stride + 1
    L_conv = L + 2 * pad - K + 1                  # stride-1 conv output length
    Lp = _round_up(L_out, 128)                    # lane-dense output width
    CL = _round_up(L_conv, 128)                   # in-kernel conv width / element
    itemsize = jnp.dtype(x.dtype).itemsize

    # Fused conv weight (k-major contraction) + column-vector biases.
    w_fused = jnp.transpose(conv_w, (0, 2, 1)).reshape(C_out, K * C_in)
    b_c = conv_b.reshape(C_out, 1)
    b1 = fc1_b.reshape(C_r, 1)
    b2 = fc2_b.reshape(C_out, 1)

    # VMEM footprint per candidate batch tile: double-buffered in/out blocks,
    # im2col slab, batched activations, padded-value copies, pooling matrix,
    # weights.  Budget kept well under a v7x-safe scoped limit (64 MiB phys).
    def vmem_bytes(t):
        x_blk = 2 * t * C_in * L * itemsize
        o_blk = 2 * t * C_out * Lp * itemsize
        pool_ = 2 * t * CL * t * 4
        slab = K * C_in * t * CL * 4
        pad_vals = t * C_in * (CL + K - 1) * 4
        y_val = C_out * t * CL * 4
        w_all = 2 * (C_out * K * C_in + 2 * C_out + 2 * C_out * C_r + C_r) * 4
        return x_blk + o_blk + pool_ + slab + pad_vals + y_val + w_all

    budget = 32 * 1024 * 1024
    bt, pad_batch = _choose_batch_tile(B, lambda t: vmem_bytes(t) <= budget)
    # NOTE: no ">=2 grid steps" constraint - on single-TensorCore v5e/v6e fewer,
    # larger grid steps win; on v7x with a large B the max_tile cap already
    # yields multiple steps for both cores.

    Bp = (-(-B // bt)) * bt if pad_batch else B
    x_in = x
    if Bp != B:
        x_in = jnp.concatenate([x, jnp.zeros((Bp - B, C_in, L), x.dtype)], axis=0)
    grid = (Bp // bt,)

    # Pooling matrix: (bt*CL, bt); entry 1/L_out where lane j of element b maps
    # to a valid strided output position, 0 elsewhere (excludes lane padding).
    r = jnp.arange(bt * CL, dtype=jnp.int32)
    b_idx = r // CL
    j = r % CL
    valid = (j % stride == 0) & (j < L_out * stride)
    pool = jnp.where(
        valid[:, None] & (b_idx[:, None] == jnp.arange(bt, dtype=jnp.int32)[None, :]),
        jnp.float32(1.0 / L_out), jnp.float32(0.0))

    kernel = functools.partial(
        _selayer_kernel, kernel_size=K, stride=stride, pad=pad,
        l_out=L_out, conv_lanes=CL)

    cost = pl.CostEstimate(
        flops=int(Bp * (2 * C_out * K * C_in * CL + 2 * C_out * CL
                        + 4 * C_out * C_r)),
        transcendentals=int(Bp * C_out),
        bytes_accessed=int(Bp * C_in * L * itemsize + Bp * C_out * Lp * itemsize
                           + (C_out * K * C_in + 2 * C_out * C_r
                              + bt * CL * bt) * 4),
    )

    out = pl.pallas_call(
        kernel,
        out_shape=jax.ShapeDtypeStruct((Bp, C_out, Lp), x.dtype),
        grid_spec=pltpu.PrefetchScalarGridSpec(
            num_scalar_prefetch=0,
            grid=grid,
            in_specs=[
                pl.BlockSpec((bt, C_in, L), lambda i: (i, 0, 0)),      # x batch tile
                pl.BlockSpec((C_out, K * C_in), lambda i: (0, 0)),     # fused conv weight
                pl.BlockSpec((C_out, 1), lambda i: (0, 0)),            # conv bias
                pl.BlockSpec((bt * CL, bt), lambda i: (0, 0)),         # pooling matrix
                pl.BlockSpec((C_r, C_out), lambda i: (0, 0)),          # fc1 weight
                pl.BlockSpec((C_r, 1), lambda i: (0, 0)),              # fc1 bias
                pl.BlockSpec((C_out, C_r), lambda i: (0, 0)),          # fc2 weight
                pl.BlockSpec((C_out, 1), lambda i: (0, 0)),            # fc2 bias
            ],
            out_specs=pl.BlockSpec((bt, C_out, Lp), lambda i: (i, 0, 0)),
        ),
        compiler_params=pltpu.CompilerParams(
            dimension_semantics=("parallel",),
            vmem_limit_bytes=48 * 1024 * 1024),
        cost_estimate=cost,
    )(x_in, w_fused, b_c, pool, fc1_w, b1, fc2_w, b2)

    if Bp != B:
        out = out[:B]
    if Lp != L_out:
        # NOTE: this slice costs one extra HBM pass over the output; keep the
        # padded (B, C_out, Lp) layout for the downstream consumer if possible.
        out = out[:, :, :L_out]
    return out


def _xavier_uniform(key, shape, fan_in, fan_out, dtype=jnp.float32):
    bound = (6.0 / (fan_in + fan_out)) ** 0.5
    return jax.random.uniform(key, shape, dtype, minval=-bound, maxval=bound)


def _reference(x, conv_w, conv_b, fc1_w, fc1_b, fc2_w, fc2_b, stride=1):
    K = conv_w.shape[2]
    pad = K // 2
    y = lax.conv_general_dilated(x, conv_w, window_strides=(stride,),
                                 padding=[(pad, pad)],
                                 dimension_numbers=("NCH", "OIH", "NCH"))
    y = jnp.maximum(y + conv_b[None, :, None], 0.0)
    s = jnp.mean(y, axis=2)                           # AdaptiveAvgPool1d(1)
    z = jnp.maximum(s @ fc1_w.T + fc1_b, 0.0)
    g = jax.nn.sigmoid(z @ fc2_w.T + fc2_b)
    return y * g[:, :, None]


if __name__ == "__main__":
    B, C_in, C_out, K, L, reduction = 2, 4, 8, 3, 16, 4
    C_r = C_out // reduction

    key = jax.random.PRNGKey(0)
    kx, kw, k1, k2 = jax.random.split(key, 4)

    x = jax.random.normal(kx, (B, C_in, L), jnp.float32)

    # deterministic xavier-uniform weights, zero biases (matches __init__)
    conv_w = _xavier_uniform(kw, (C_out, C_in, K), fan_in=C_in * K, fan_out=C_out * K)
    conv_b = jnp.zeros((C_out,), jnp.float32)
    fc1_w = _xavier_uniform(k1, (C_r, C_out), fan_in=C_out, fan_out=C_r)
    fc1_b = jnp.zeros((C_r,), jnp.float32)
    fc2_w = _xavier_uniform(k2, (C_out, C_r), fan_in=C_r, fan_out=C_out)
    fc2_b = jnp.zeros((C_out,), jnp.float32)

    out = selayer_forward(x, conv_w, conv_b, fc1_w, fc1_b, fc2_w, fc2_b, stride=1)
    out = jax.block_until_ready(out)

    ref = _reference(x, conv_w, conv_b, fc1_w, fc1_b, fc2_w, fc2_b, stride=1)
    assert out.shape == ref.shape
    assert jnp.allclose(out, ref, atol=1e-5, rtol=1e-5), "mismatch vs reference"

    print("KERNEL_OK")
</pallas_src>

<mosaic_0001>
module attributes {stable_mosaic.version = 11 : i64} {
  func.func @_selayer_kernel(%arg0: i32, %arg1: memref<2x4x16xf32, #tpu.memory_space<vmem>>, %arg2: memref<8x12xf32, #tpu.memory_space<vmem>>, %arg3: memref<8x1xf32, #tpu.memory_space<vmem>>, %arg4: memref<256x2xf32, #tpu.memory_space<vmem>>, %arg5: memref<2x8xf32, #tpu.memory_space<vmem>>, %arg6: memref<2x1xf32, #tpu.memory_space<vmem>>, %arg7: memref<8x2xf32, #tpu.memory_space<vmem>>, %arg8: memref<8x1xf32, #tpu.memory_space<vmem>>, %arg9: memref<2x8x128xf32, #tpu.memory_space<vmem>>) attributes {dimension_semantics = [#tpu.dimension_semantics<parallel>], iteration_bounds = array<i64: 1>, scalar_prefetch = 0 : i64, scratch_operands = 0 : i64, tpu.core_type = #tpu.core_type<tc>, window_params = [{transform_indices = @transform_0, window_bounds = array<i64: 2, 4, 16>}, {pipeline_mode = #tpu.pipeline_mode<synchronous>, transform_indices = @transform_1, window_bounds = array<i64: 8, 12>}, {pipeline_mode = #tpu.pipeline_mode<synchronous>, transform_indices = @transform_2, window_bounds = array<i64: 8, 1>}, {pipeline_mode = #tpu.pipeline_mode<synchronous>, transform_indices = @transform_3, window_bounds = array<i64: 256, 2>}, {pipeline_mode = #tpu.pipeline_mode<synchronous>, transform_indices = @transform_4, window_bounds = array<i64: 2, 8>}, {pipeline_mode = #tpu.pipeline_mode<synchronous>, transform_indices = @transform_5, window_bounds = array<i64: 2, 1>}, {pipeline_mode = #tpu.pipeline_mode<synchronous>, transform_indices = @transform_6, window_bounds = array<i64: 8, 2>}, {pipeline_mode = #tpu.pipeline_mode<synchronous>, transform_indices = @transform_7, window_bounds = array<i64: 8, 1>}, {transform_indices = @transform_8, window_bounds = array<i64: 2, 8, 128>}]} {
    %c0 = arith.constant 0 : index
    %c0_0 = arith.constant 0 : index
    %c0_1 = arith.constant 0 : index
    %0 = vector.load %arg1[%c0, %c0_0, %c0_1] : memref<2x4x16xf32, #tpu.memory_space<vmem>>, vector<1x4x16xf32>
    %1 = vector.shape_cast %0 : vector<1x4x16xf32> to vector<4x16xf32>
    %cst = arith.constant 0.000000e+00 : f32
    %2 = vector.broadcast %cst : f32 to vector<4x1xf32>
    %cst_2 = arith.constant 0.000000e+00 : f32
    %3 = vector.broadcast %cst_2 : f32 to vector<4x113xf32>
    %4 = tpu.concatenate %2, %1, %3 in 1 : vector<4x1xf32>, vector<4x16xf32>, vector<4x113xf32> -> vector<4x130xf32>
    %5 = vector.extract_strided_slice %4 {offsets = [0, 0], sizes = [4, 128], strides = [1, 1]} : vector<4x130xf32> to vector<4x128xf32>
    %6 = vector.extract_strided_slice %4 {offsets = [0, 1], sizes = [4, 128], strides = [1, 1]} : vector<4x130xf32> to vector<4x128xf32>
    %7 = vector.extract_strided_slice %4 {offsets = [0, 2], sizes = [4, 128], strides = [1, 1]} : vector<4x130xf32> to vector<4x128xf32>
    %8 = tpu.concatenate %5, %6, %7 in 0 : vector<4x128xf32>, vector<4x128xf32>, vector<4x128xf32> -> vector<12x128xf32>
    %c1 = arith.constant 1 : index
    %c0_3 = arith.constant 0 : index
    %c0_4 = arith.constant 0 : index
    %9 = vector.load %arg1[%c1, %c0_3, %c0_4] : memref<2x4x16xf32, #tpu.memory_space<vmem>>, vector<1x4x16xf32>
    %10 = vector.shape_cast %9 : vector<1x4x16xf32> to vector<4x16xf32>
    %cst_5 = arith.constant 0.000000e+00 : f32
    %11 = vector.broadcast %cst_5 : f32 to vector<4x1xf32>
    %cst_6 = arith.constant 0.000000e+00 : f32
    %12 = vector.broadcast %cst_6 : f32 to vector<4x113xf32>
    %13 = tpu.concatenate %11, %10, %12 in 1 : vector<4x1xf32>, vector<4x16xf32>, vector<4x113xf32> -> vector<4x130xf32>
    %14 = vector.extract_strided_slice %13 {offsets = [0, 0], sizes = [4, 128], strides = [1, 1]} : vector<4x130xf32> to vector<4x128xf32>
    %15 = vector.extract_strided_slice %13 {offsets = [0, 1], sizes = [4, 128], strides = [1, 1]} : vector<4x130xf32> to vector<4x128xf32>
    %16 = vector.extract_strided_slice %13 {offsets = [0, 2], sizes = [4, 128], strides = [1, 1]} : vector<4x130xf32> to vector<4x128xf32>
    %17 = tpu.concatenate %14, %15, %16 in 0 : vector<4x128xf32>, vector<4x128xf32>, vector<4x128xf32> -> vector<12x128xf32>
    %18 = tpu.concatenate %8, %17 in 1 : vector<12x128xf32>, vector<12x128xf32> -> vector<12x256xf32>
    %c0_7 = arith.constant 0 : index
    %c0_8 = arith.constant 0 : index
    %19 = vector.load %arg2[%c0_7, %c0_8] : memref<8x12xf32, #tpu.memory_space<vmem>>, vector<8x12xf32>
    %cst_9 = arith.constant dense<0.000000e+00> : vector<8x256xf32>
    %20 = tpu.matmul %19, %18, %cst_9 {dimension_numbers = #tpu.dot_dimension_numbers<[1], [0], [0], [1], [0, 0, 1, 1], [], []>} : vector<8x12xf32>, vector<12x256xf32>, vector<8x256xf32> -> vector<8x256xf32>
    %c0_10 = arith.constant 0 : index
    %c0_11 = arith.constant 0 : index
    %21 = vector.load %arg3[%c0_10, %c0_11] : memref<8x1xf32, #tpu.memory_space<vmem>>, vector<8x1xf32>
    %22 = vector.broadcast %21 : vector<8x1xf32> to vector<8x256xf32>
    %23 = arith.addf %20, %22 : vector<8x256xf32>
    %cst_12 = arith.constant 0.000000e+00 : f32
    %24 = vector.broadcast %cst_12 : f32 to vector<8x256xf32>
    %25 = arith.maximumf %23, %24 : vector<8x256xf32>
    %c0_13 = arith.constant 0 : index
    %c0_14 = arith.constant 0 : index
    %26 = vector.load %arg4[%c0_13, %c0_14] : memref<256x2xf32, #tpu.memory_space<vmem>>, vector<256x2xf32>
    %cst_15 = arith.constant dense<0.000000e+00> : vector<8x2xf32>
    %27 = tpu.matmul %25, %26, %cst_15 {dimension_numbers = #tpu.dot_dimension_numbers<[1], [0], [0], [1], [0, 0, 1, 1], [], []>} : vector<8x256xf32>, vector<256x2xf32>, vector<8x2xf32> -> vector<8x2xf32>
    %c0_16 = arith.constant 0 : index
    %c0_17 = arith.constant 0 : index
    %28 = vector.load %arg5[%c0_16, %c0_17] : memref<2x8xf32, #tpu.memory_space<vmem>>, vector<2x8xf32>
    %cst_18 = arith.constant dense<0.000000e+00> : vector<2x2xf32>
    %29 = tpu.matmul %28, %27, %cst_18 {dimension_numbers = #tpu.dot_dimension_numbers<[1], [0], [0], [1], [0, 0, 1, 1], [], []>} : vector<2x8xf32>, vector<8x2xf32>, vector<2x2xf32> -> vector<2x2xf32>
    %c0_19 = arith.constant 0 : index
    %c0_20 = arith.constant 0 : index
    %30 = vector.load %arg6[%c0_19, %c0_20] : memref<2x1xf32, #tpu.memory_space<vmem>>, vector<2x1xf32>
    %31 = vector.broadcast %30 : vector<2x1xf32> to vector<2x2xf32>
    %32 = arith.addf %29, %31 : vector<2x2xf32>
    %cst_21 = arith.constant 0.000000e+00 : f32
    %33 = vector.broadcast %cst_21 : f32 to vector<2x2xf32>
    %34 = arith.maximumf %32, %33 : vector<2x2xf32>
    %c0_22 = arith.constant 0 : index
    %c0_23 = arith.constant 0 : index
    %35 = vector.load %arg7[%c0_22, %c0_23] : memref<8x2xf32, #tpu.memory_space<vmem>>, vector<8x2xf32>
    %cst_24 = arith.constant dense<0.000000e+00> : vector<8x2xf32>
    %36 = tpu.matmul %35, %34, %cst_24 {dimension_numbers = #tpu.dot_dimension_numbers<[1], [0], [0], [1], [0, 0, 1, 1], [], []>} : vector<8x2xf32>, vector<2x2xf32>, vector<8x2xf32> -> vector<8x2xf32>
    %c0_25 = arith.constant 0 : index
    %c0_26 = arith.constant 0 : index
    %37 = vector.load %arg8[%c0_25, %c0_26] : memref<8x1xf32, #tpu.memory_space<vmem>>, vector<8x1xf32>
    %38 = vector.broadcast %37 : vector<8x1xf32> to vector<8x2xf32>
    %39 = arith.addf %36, %38 : vector<8x2xf32>
    %40 = arith.negf %39 : vector<8x2xf32>
    %41 = math.exp %40 : vector<8x2xf32>
    %cst_27 = arith.constant 1.000000e+00 : f32
    %42 = vector.broadcast %cst_27 : f32 to vector<8x2xf32>
    %43 = arith.addf %42, %41 : vector<8x2xf32>
    %44 = arith.divf %42, %43 : vector<8x2xf32>
    %45 = vector.extract_strided_slice %25 {offsets = [0, 0], sizes = [8, 128], strides = [1, 1]} : vector<8x256xf32> to vector<8x128xf32>
    %46 = vector.extract_strided_slice %44 {offsets = [0, 0], sizes = [8, 1], strides = [1, 1]} : vector<8x2xf32> to vector<8x1xf32>
    %47 = vector.broadcast %46 : vector<8x1xf32> to vector<8x128xf32>
    %48 = arith.mulf %45, %47 : vector<8x128xf32>
    %c0_28 = arith.constant 0 : index
    %c0_29 = arith.constant 0 : index
    %c0_30 = arith.constant 0 : index
    %49 = vector.load %arg9[%c0_28, %c0_29, %c0_30] : memref<2x8x128xf32, #tpu.memory_space<vmem>>, vector<1x8x128xf32>
    %50 = vector.shape_cast %49 : vector<1x8x128xf32> to vector<8x128xf32>
    %51 = vector.shape_cast %48 : vector<8x128xf32> to vector<1x8x128xf32>
    tpu.vector_store %arg9[%c0_28, %c0_29, %c0_30], %51 {strides = array<i32>} : memref<2x8x128xf32, #tpu.memory_space<vmem>>, vector<1x8x128xf32>,
    %52 = vector.extract_strided_slice %25 {offsets = [0, 128], sizes = [8, 128], strides = [1, 1]} : vector<8x256xf32> to vector<8x128xf32>
    %53 = vector.extract_strided_slice %44 {offsets = [0, 1], sizes = [8, 1], strides = [1, 1]} : vector<8x2xf32> to vector<8x1xf32>
    %54 = vector.broadcast %53 : vector<8x1xf32> to vector<8x128xf32>
    %55 = arith.mulf %52, %54 : vector<8x128xf32>
    %c1_31 = arith.constant 1 : index
    %c0_32 = arith.constant 0 : index
    %c0_33 = arith.constant 0 : index
    %56 = vector.load %arg9[%c1_31, %c0_32, %c0_33] : memref<2x8x128xf32, #tpu.memory_space<vmem>>, vector<1x8x128xf32>
    %57 = vector.shape_cast %56 : vector<1x8x128xf32> to vector<8x128xf32>
    %58 = vector.shape_cast %55 : vector<8x128xf32> to vector<1x8x128xf32>
    tpu.vector_store %arg9[%c1_31, %c0_32, %c0_33], %58 {strides = array<i32>} : memref<2x8x128xf32, #tpu.memory_space<vmem>>, vector<1x8x128xf32>,
    return
  }
  func.func @transform_0(%arg0: i32) -> (i32, i32, i32) {
    %c0_i32 = arith.constant 0 : i32
    %c0_i32_0 = arith.constant 0 : i32
    %c0_i32_1 = arith.constant 0 : i32
    return %arg0, %c0_i32, %c0_i32_0 : i32, i32, i32
  }
  func.func @transform_1(%arg0: i32) -> (i32, i32) {
    %c0_i32 = arith.constant 0 : i32
    %c0_i32_0 = arith.constant 0 : i32
    %c0_i32_1 = arith.constant 0 : i32
    return %c0_i32, %c0_i32_0 : i32, i32
  }
  func.func @transform_2(%arg0: i32) -> (i32, i32) {
    %c0_i32 = arith.constant 0 : i32
    %c0_i32_0 = arith.constant 0 : i32
    %c0_i32_1 = arith.constant 0 : i32
    return %c0_i32, %c0_i32_0 : i32, i32
  }
  func.func @transform_3(%arg0: i32) -> (i32, i32) {
    %c0_i32 = arith.constant 0 : i32
    %c0_i32_0 = arith.constant 0 : i32
    %c0_i32_1 = arith.constant 0 : i32
    return %c0_i32, %c0_i32_0 : i32, i32
  }
  func.func @transform_4(%arg0: i32) -> (i32, i32) {
    %c0_i32 = arith.constant 0 : i32
    %c0_i32_0 = arith.constant 0 : i32
    %c0_i32_1 = arith.constant 0 : i32
    return %c0_i32, %c0_i32_0 : i32, i32
  }
  func.func @transform_5(%arg0: i32) -> (i32, i32) {
    %c0_i32 = arith.constant 0 : i32
    %c0_i32_0 = arith.constant 0 : i32
    %c0_i32_1 = arith.constant 0 : i32
    return %c0_i32, %c0_i32_0 : i32, i32
  }
  func.func @transform_6(%arg0: i32) -> (i32, i32) {
    %c0_i32 = arith.constant 0 : i32
    %c0_i32_0 = arith.constant 0 : i32
    %c0_i32_1 = arith.constant 0 : i32
    return %c0_i32, %c0_i32_0 : i32, i32
  }
  func.func @transform_7(%arg0: i32) -> (i32, i32) {
    %c0_i32 = arith.constant 0 : i32
    %c0_i32_0 = arith.constant 0 : i32
    %c0_i32_1 = arith.constant 0 : i32
    return %c0_i32, %c0_i32_0 : i32, i32
  }
  func.func @transform_8(%arg0: i32) -> (i32, i32, i32) {
    %c0_i32 = arith.constant 0 : i32
    %c0_i32_0 = arith.constant 0 : i32
    %c0_i32_1 = arith.constant 0 : i32
    return %arg0, %c0_i32, %c0_i32_0 : i32, i32, i32
  }
}

</mosaic_0001>

<bundles_post_ra>
// kernel: tpu_custom_call.1
= control target key start
LH: loop header
LB: loop body
LE: loop exit
PB: predicated region body
PF: predicated region fallthrough
CT: control target
= control target key end

     0   :  { %s826_s0 = inlined_call_operand.vmem [shape: f32[2,4,16], index: 0, kind: input, shape index: {}]   ;;  %s827_s1 = inlined_call_operand.vmem [shape: f32[8,12], index: 1, kind: input, shape index: {}]   ;;  %s828_s2 = inlined_call_operand.vmem [shape: f32[8,1], index: 2, kind: input, shape index: {}]   ;;  %s829_s3 = inlined_call_operand.vmem [shape: f32[256,2], index: 3, kind: input, shape index: {}]   ;;  %s830_s4 = inlined_call_operand.vmem [shape: f32[2,8], index: 4, kind: input, shape index: {}]   ;;  %s831_s5 = inlined_call_operand.vmem [shape: f32[2,1], index: 5, kind: input, shape index: {}]   ;;  %s832_s6 = inlined_call_operand.vmem [shape: f32[8,2], index: 6, kind: input, shape index: {}]   ;;  %s833_s7 = inlined_call_operand.vmem [shape: f32[8,1], index: 7, kind: input, shape index: {}]   ;;  %s834_s8 = inlined_call_operand.hbm [shape: f32[2,8,128], index: 8, kind: output, shape index: {}]  }
   0x1   :  { %v30_v0 = vld [vmem:[%s826_s0] sm:$0xf]  ;;  %v469_v1 = vld [vmem:[%s826_s0 + $0x4] sm:$0xf] }
   0x2   :  { %v575_v2 = vpack.i.bf16 %v30_v0, %v469_v1 }
   0x3   :  { %13 = vsyncpa [#allocation3], 0  ;;  %v621_v3 = vmov 0.0   ;;  %s622_s9 = smov 1   ;;  %vm35_vm0 = vcmask 7168   ;;  %vm37_vm1 = vcmask 138240  }
   0x4   :  { %155 = vmatprep.mubr.f32.mxu0 %v621_v3  ;;  %576 = vrot.lane.b32.xlu0 %v575_v2, %s622_s9  ;;  %v42_v9 = vrot.slane %v621_v3, 4  ;;  %s623_s0 = smov 127   ;;  %v180_v15 = vld [vmem:[%s829_s3 + $0x80] sm:$0xff]  ;;  %v624_v16 = vmov 0   ;;  %v181_v17 = vld [vmem:[%s829_s3 + $0x88] sm:$0xff]  ;;  %v182_v23 = vld [vmem:[%s829_s3 + $0x90] sm:$0xff] }
   0x5   :  { %590 = vset.pattern.permute.xlu1 %v624_v16  ;;  %v164_v18 = vld [vmem:[%s829_s3] sm:$0xff]  ;;  %v165_v19 = vld [vmem:[%s829_s3 + $0x8] sm:$0xff]  ;;  %591 = vset.pattern.permute.xlu0 %v624_v16  ;;  %v532_v21 = vpack.c.bf16 %v181_v17, %v180_v15  ;;  %v183_v24 = vld [vmem:[%s829_s3 + $0x98] sm:$0xff]  ;;  %s625_s30 = smov 126   ;;  %vm47_vm2 = vcmask 1039360   ;;  %vm56_vm3 = vcmask 1043456  }
   0x6   :  { %v534_v22 = vpack.c.bf16 %v165_v19, %v164_v18  ;;  %v166_v25 = vld [vmem:[%s829_s3 + $0x10] sm:$0xff]  ;;  %v536_v26 = vpack.c.bf16 %v183_v24, %v182_v23  ;;  %v167_v27 = vld [vmem:[%s829_s3 + $0x18] sm:$0xff]  ;;  %v184_v28 = vld [vmem:[%s829_s3 + $0xa0] sm:$0xff]  ;;  %vm54_vm4 = vcmask 1031168   ;;  %vm626_vm5 = vmmov 1  }
   0x7   :  { %v185_v29 = vld [vmem:[%s829_s3 + $0xa8] sm:$0xff]  ;;  %533 = vmatprep.subr.bf16.mxu1 %v532_v21  ;;  %v77_v30 = vld [vmem:[%s828_s2] sm:$0xff]  ;;  %v538_v31 = vpack.c.bf16 %v167_v27, %v166_v25  ;;  %v186_v35 = vld [vmem:[%s829_s3 + $0xb0] sm:$0xff]  ;;  %vm83_vm7 = vcmask 97280   ;;  %vm627_vm8 = vmmov 0   ;;  %vm273_vm9 = vcmask 64512  }
   0x8   :  { %535 = vmatpush3.bf16.msra.mxu1 %v534_v22  ;;  %v540_v32 = vpack.c.bf16 %v185_v29, %v184_v28  ;;  %v168_v33 = vld [vmem:[%s829_s3 + $0x20] sm:$0xff]  ;;  %v169_v34 = vld [vmem:[%s829_s3 + $0x28] sm:$0xff]  ;;  %v187_v36 = vld [vmem:[%s829_s3 + $0xb8] sm:$0xff]  ;;  %vm359_vm10 = vcmask 1041408   ;;  %vm355_vm11 = vcmask 15360  }
   0x9   :  { %537 = vmatprep.subr.bf16.mxu1 %v536_v26  ;;  %v349_v37 = vld [vmem:[%s833_s7] sm:$0xff]  ;;  %v542_v38 = vpack.c.bf16 %v169_v34, %v168_v33  ;;  %v544_v39 = vpack.c.bf16 %v187_v36, %v186_v35  ;;  %v170_v40 = vld [vmem:[%s829_s3 + $0x30] sm:$0xff]  ;;  %v171_v41 = vld [vmem:[%s829_s3 + $0x38] sm:$0xff] }
   0xa   :  { %v188_v42 = vld [vmem:[%s829_s3 + $0xc0] sm:$0xff]  ;;  %v189_v43 = vld [vmem:[%s829_s3 + $0xc8] sm:$0xff]  ;;  %v546_v44 = vpack.c.bf16 %v171_v41, %v170_v40  ;;  %v190_v48 = vld [vmem:[%s829_s3 + $0xd0] sm:$0xff] }
   0xb   :  { %v548_v45 = vpack.c.bf16 %v189_v43, %v188_v42  ;;  %v172_v46 = vld [vmem:[%s829_s3 + $0x40] sm:$0xff]  ;;  %v173_v47 = vld [vmem:[%s829_s3 + $0x48] sm:$0xff]  ;;  %v191_v49 = vld [vmem:[%s829_s3 + $0xd8] sm:$0xff] }
   0xc   :  { %539 = vmatpush3.bf16.msra.mxu1 %v538_v31  ;;  %v550_v50 = vpack.c.bf16 %v173_v47, %v172_v46  ;;  %v552_v51 = vpack.c.bf16 %v191_v49, %v190_v48  ;;  %v174_v52 = vld [vmem:[%s829_s3 + $0x50] sm:$0xff]  ;;  %v175_v53 = vld [vmem:[%s829_s3 + $0x58] sm:$0xff]  ;;  %v192_v54 = vld [vmem:[%s829_s3 + $0xe0] sm:$0xff] }
   0xd   :  { %541 = vmatprep.subr.bf16.mxu1 %v540_v32  ;;  %v193_v55 = vld [vmem:[%s829_s3 + $0xe8] sm:$0xff]  ;;  %v554_v56 = vpack.c.bf16 %v175_v53, %v174_v52  ;;  %vm527_vm6 = vmpackc.low %vm56_vm3, %vm626_vm5  ;;  %v194_v15 = vld [vmem:[%s829_s3 + $0xf0] sm:$0xff] }
   0xe   :  { %v556_v57 = vpack.c.bf16 %v193_v55, %v192_v54  ;;  %v195_v16 = vld [vmem:[%s829_s3 + $0xf8] sm:$0xff]  ;;  %v178_v18 = vld [vmem:[%s829_s3 + $0x70] sm:$0xff]  ;;  %v267_v28 = vld [vmem:[%s831_s5] sm:$0x3] }
   0xf   :  { %v560_v17 = vpack.c.bf16 %v195_v16, %v194_v15  ;;  %v179_v19 = vld [vmem:[%s829_s3 + $0x78] sm:$0xff]  ;;  %v266_v32 = vld [vmem:[%s830_s4] sm:$0x3]  ;;  %s629_s4 = smov [#allocation2]  }
  0x10   :  { %543 = vmatpush3.bf16.msra.mxu1 %v542_v38  ;;  %v348_v38 = vld [vmem:[%s832_s6] sm:$0xff]  ;;  %s458_s11 = sshll.u32 %s629_s4, 4  ;;  %s459_s11 = int_to_ptr.vmem [resolvable:$true] %s458_s11 }
  0x11   :  { %545 = vmatprep.subr.bf16.mxu1 %v544_v39  ;;  %v628_v39 = vmov 1   ;;  %s597_s6 = scalar_lea.vmem %s459_s11, 256  ;;  %p602_p1 = scmp.lt.s32.totalorder %s459_s11, %s459_s11 }
  0x12   :  { %p598_p0 = scmp.ne.s32.totalorder %s459_s11, %s597_s6  ;;  %p603_p2 = scmp.lt.s32.totalorder %s597_s6, %s597_s6 }
  0x14   :  { %547 = vmatpush3.bf16.msra.mxu1 %v546_v44  ;;  %p604_p3 = por %p603_p2, %p602_p1 }
  0x15   :  { %549 = vmatprep.subr.bf16.mxu1 %v548_v45 }
  0x16   :  { %p605_p4 = pnand %p604_p3, %p598_p0 }
  0x18   :  { %551 = vmatpush3.bf16.msra.mxu1 %v550_v50 }
  0x19   :  { %553 = vmatprep.subr.bf16.mxu1 %v552_v51 }
  0x1c   :  { %555 = vmatpush3.bf16.msra.mxu1 %v554_v56 }
  0x1d   :  { %557 = vmatprep.subr.bf16.mxu1 %v556_v57 }
  0x76   :  { %v577_v4 = vpop.permute.xlu0 %576 }
  0x77   :  { %v579_v5 = vunpack.i.h.bf16 %v577_v4  ;;  %v578_v6 = vunpack.i.l.bf16 %v577_v4 }
  0x79   :  { %v36_v7 = vsel %vm35_vm0, 0.0, %v579_v5  ;;  %v64_v8 = vsel %vm35_vm0, 0.0, %v578_v6 }
  0x7a   :  { %v685_v10 = vsel %vm37_vm1, %v64_v8, 0.0  ;;  %v687_v11 = vsel %vm37_vm1, %v36_v7, 0.0 }
  0x7b   :  { %v41_v12 = vrot.slane %v687_v11, 4  ;;  %v67_v13 = vrot.slane %v685_v10, 4  ;;  %v585_v20 = vpack.i.bf16 %v685_v10, %v621_v3 }
  0x7d   :  { %43 = vrot.lane.b32.xlu1 %v41_v12, %s623_s0  ;;  %v580_v14 = vpack.i.bf16 %v67_v13, %v42_v9  ;;  %v76_v13 = vld [vmem:[%s827_s1] sm:$0xff] }
  0x7f   :  { %581 = vrot.lane.b32.xlu0 %v580_v14, %s623_s0 }
  0x81   :  { %586 = vrot.lane.b32.xlu1 %v585_v20, %s625_s30  ;;  %v562_v20 = vpack.c.bf16 %v179_v19, %v178_v18 }
  0x83   :  { %50 = vrot.lane.b32.xlu0 %v687_v11, %s625_s30 }
  0x85   :  { %80 = vperm.xlu1 %590, %v77_v30  }
  0x87   :  { %270 = vperm.xlu0 %591, %v267_v28  }
  0x89   :  { %352 = vperm.xlu1 %590, %v349_v37  }
  0x8b   :  { %592 = vset.pattern.permute.xlu0 %v628_v39 }
  0xef   :  { %v44_v58 = vpop.permute.xlu1 %43 }
  0xf1   :  { %v582_v59 = vpop.permute.xlu0 %581 }
  0xf2   :  { %v584_v60 = vunpack.i.h.bf16 %v582_v59  ;;  %v583_v61 = vunpack.i.l.bf16 %v582_v59 }
  0xf3   :  { %v587_v62 = vpop.permute.xlu1 %586 }
  0xf4   :  { %v589_v63 = vunpack.i.h.bf16 %v587_v62  ;;  %v588_v0 = vunpack.i.l.bf16 %v587_v62  ;;  %v48_v1 = vsel %vm47_vm2, %v44_v58, %v583_v61  ;;  %v70_v2 = vsel %vm47_vm2, %v584_v60, %v583_v61 }
  0xf5   :  { %v51_v4 = vpop.permute.xlu0 %50  ;;  %v57_v5 = vsel %vm56_vm3, %v687_v11, %v48_v1  ;;  %v75_v6 = vsel %vm56_vm3, %v685_v10, %v70_v2  ;;  %v176_v10 = vld [vmem:[%s829_s3 + $0x60] sm:$0xff]  ;;  %v177_v11 = vld [vmem:[%s829_s3 + $0x68] sm:$0xff] }
  0xf6   :  { %v55_v7 = vsel %vm54_vm4, %v51_v4, %v588_v0  ;;  %v74_v8 = vsel %vm54_vm4, %v589_v63, %v588_v0  ;;  %v558_v14 = vpack.c.bf16 %v177_v11, %v176_v10 }
  0xf7   :  { %v529_v9 = vpack.c.bf16 %v55_v7, %v57_v5  ;;  %v526_v12 = vpack.c.bf16 %v74_v8, %v75_v6 }
  0xf8   :  { %559 = vmatpush3.bf16.msra.mxu1 %v558_v14 }
  0xf9   :  { %528 = vmatprep.subr.msk.bf16.mxu0 %vm527_vm6, %v526_v12  ;;  %561 = vmatprep.subr.bf16.mxu1 %v560_v17 }
  0xfa   :  { %531 = vmatpush1.bf16.msk.msra.mxu0 %vm527_vm6, %v529_v9 }
  0xfb   :  { %516 = vmatprep.subr.mxu0 %v621_v3 }
  0xfc   :  { %563 = vmatpush3.bf16.msra.mxu1 %v562_v20 }
  0xfd   :  { %472 = vmatmul.mubr.msk.f32.vlgmr.msra.gmra.mrb[0].mxu0 %vm83_vm7, %v76_v13 }
  0xfe   :  { %518 = vmatprep.mubr.msk.f32.mxu0 %vm627_vm8, %v621_v3 }
 0x104   :  { %v81_v21 = vpop.permute.xlu1 %80 }
 0x106   :  { %v271_v33 = vpop.permute.xlu0 %270 }
 0x108   :  { %v353_v40 = vpop.permute.xlu1 %352 }
 0x1d0   :  { %v157_v22 = vpop.f32.mrb[0].mxu0 }
 0x1d1   :  { %v158_v23 = vadd.f32 %v157_v22, %v81_v21  ;;  %v159_v24 = vpop.f32.mrb[1].mxu0 }
 0x1d2   :  { %v160_v25 = vadd.f32 %v159_v24, %v81_v21 }
 0x1d3   :  { %v162_v27 = vmax.f32 %v158_v23, 0.0 }
 0x1d4   :  { %v163_v26 = vmax.f32 %v160_v25, 0.0 }
 0x1d6   :  { %260 = vmatprep.mubr.f32.mxu1 %v163_v26 }
 0x1d7   :  { %261 = vmatmul.mubr.f32.vlgmr.msra.gmra.mrb[0].mxu1 %v162_v27 }
 0x2aa   :  { %v509_v29 = vpop.f32.mrb[0].mxu1 }
 0x2ab   :  { %v510_v30 = vpop.f32.mrb[1].mxu1 }
 0x2ac   :  { %v511_v31 = vadd.f32 %v510_v30, %v509_v29 }
 0x2ae   :  { %517 = vmatpush3.msra.mxu0 %v511_v31 }
 0x2af   :  { %519 = vmatmul.mubr.msk.f32.vlgmr.msra.gmra.mrb[2].mxu0 %vm273_vm9, %v266_v32  ;;  %521 = vmatprep.subr.mxu0 %v621_v3 }
 0x2b0   :  { %523 = vmatprep.mubr.msk.f32.mxu0 %vm627_vm8, %v621_v3 }
 0x382   :  { %v343_v34 = vpop.f32.mrb[2].mxu0 }
 0x383   :  { %v344_v35 = vadd.f32 %v343_v34, %v271_v33  ;;  %v520_v36 = vpop.f32.mrb[3].mxu0 }
 0x385   :  { %v347_v37 = vmax.f32 %v344_v35, 0.0 }
 0x387   :  { %522 = vmatpush3.msk.msra.mxu0 %vm359_vm10, %v347_v37 }
 0x388   :  { %524 = vmatmul.mubr.msk.f32.vlgmr.msra.gmra.mrb[4].mxu0 %vm355_vm11, %v348_v38 }
 0x45b   :  { %v429_v41 = vpop.f32.mrb[4].mxu0 }
 0x45c   :  { %v430_v42 = vadd.f32 %v429_v41, %v353_v40  ;;  %v525_v43 = vpop.f32.mrb[5].mxu0 }
 0x45e   :  { %v476_v3 = vmul.f32 -1.442695, %v430_v42 }
 0x460   :  { %593 = vpow2.f32 %v476_v3 }
 0x46a   :  { %v594_v44 = vpop.eup %593 }
 0x46b   :  { %v436_v45 = vadd.f32 1.0, %v594_v44 }
 0x46d   :  { %595 = vrcp.f32 %v436_v45 }
 0x477   :  { %v596_v46 = vpop.eup %595 }
 0x478   :  { %447 = vperm.xlu0 %592, %v596_v46   ;;  %441 = vperm.xlu1 %590, %v596_v46  }
 0x4f7   :  { %v448_v47 = vpop.permute.xlu0 %447  ;;  %v442_v48 = vpop.permute.xlu1 %441 }
 0x4f8   :  { %v450_v49 = vmul.f32 %v448_v47, %v163_v26  ;;  %v444_v50 = vmul.f32 %v442_v48, %v162_v27 }
 0x4fa   :  { %452 = vst [vmem:[#allocation2 + $0x8] sm:$0xff] %v450_v49  ;;  %445 = vst [vmem:[#allocation2] sm:$0xff] %v444_v50 }
 0x4fb   :  { %608 = shalt.err (!%p605_p4)
}
 0x4fc   :  { %s609_s14 = scalar_lea.hbm %s834_s8, 256 }
 0x4fd   :  { %p610_p5 = scmp.ne.s32.totalorder %s834_s8, %s609_s14  ;;  %p613_p6 = scmp.lt.u32.totalorder %s609_s14, %s834_s8 }
 0x4ff   :  { %p615_p7 = pnand %p613_p6, %p610_p5 }
 0x501   :  { %618 = shalt.err (!%p615_p7)
}
 0x502   :  { %s630_s18 = smov 128   ;;  %s631_s19 = smov 8  }
 0x503   :  { %464 = dma.vmem_to_hbm [thread:$0]  %s459_s11, 256, %s834_s8, [#allocation3], %s630_s18, %s630_s18, %s631_s19  }
 0x504   :  { %619 = dma.done.wait [#allocation3], 256  }
 0x505   :  { %620 = vsyncadd [#allocation3], 4294967040 }
 0x506   :  { %468 = vsyncpa [#allocation3], 1 }

</bundles_post_ra>
